<compile_context>
chip_gen: v7x
topology: tpu7x:2x2x1
jax: 0.10.0
libtpu: 0.0.40
codegen_flags: <defaults>
</compile_context>

<pallas_src>
import jax
import jax.numpy as jnp
from jax.experimental import pallas as pl
from jax.experimental.pallas import tpu as pltpu


# ----------------------------------------------------------------------------
# helpers
# ----------------------------------------------------------------------------
def _round_up(x, m):
    return (x + m - 1) // m * m


def _choose_rows_per_step(rows, s_max):
    """Sublane-rows of 128 lanes handled per grid step.

    Multiple of 8 (or == rows when tiny) so the (sublane, lane) block dims stay
    layout-legal, and aims for >= 2 grid steps so the "parallel" grid axis can
    shard across both v7x TensorCores.
    """
    if rows <= 8:
        return rows
    s = _round_up(pl.cdiv(rows, 2), 8)
    return min(s, s_max)


# ----------------------------------------------------------------------------
# kernels
# ----------------------------------------------------------------------------
def _follow_pos_kernel(v_ref, r_ref, p_ref, out_ref):
    """Partial SSE of (virtual, normalize(quat_product(real, postion))).

    Refs are (4, S, 128) f32: component-major, batch dense on sublanes x lanes.
    Pure VPU/EUP work; padded quaternions are identities -> zero error.
    """
    # component tiles, each (S, 128)
    v0, v1, v2, v3 = v_ref[0], v_ref[1], v_ref[2], v_ref[3]
    x1, y1, z1, w1 = r_ref[0], r_ref[1], r_ref[2], r_ref[3]
    x2, y2, z2, w2 = p_ref[0], p_ref[1], p_ref[2], p_ref[3]

    # quaternion product q = real * postion
    qw = w1 * w2 - x1 * x2 - y1 * y2 - z1 * z2
    qx = w1 * x2 + x1 * w2 + y1 * z2 - z1 * y2
    qy = w1 * y2 + y1 * w2 + z1 * x2 - x1 * z2
    qz = w1 * z2 + z1 * w2 + x1 * y2 - y1 * x2

    # per-element normalization: rsqrt on the EUP, guarded denominator
    sumsq = qx * qx + qy * qy + qz * qz + qw * qw
    inv = jax.lax.rsqrt(jnp.maximum(sumsq, 1e-12))
    big = sumsq > 1e-12                       # == (norm > 1e-6)

    dx = v0 - jnp.where(big, qx * inv, 0.0)
    dy = v1 - jnp.where(big, qy * inv, 0.0)
    dz = v2 - jnp.where(big, qz * inv, 0.0)
    dw = v3 - jnp.where(big, qw * inv, 1.0)   # constant-1 fallback (see header)

    sq = dx * dx + dy * dy + dz * dz + dw * dw            # (S, 128)
    out_ref[...] = jnp.sum(sq, axis=0, keepdims=True)     # lane-wise partial


def _mse_kernel(a_ref, b_ref, out_ref):
    """Partial SSE of two (S, 128) f32 tiles (real_postion=None path)."""
    d = a_ref[...] - b_ref[...]
    out_ref[...] = jnp.sum(d * d, axis=0, keepdims=True)  # lane-wise partial


_COMPILER_PARAMS = pltpu.CompilerParams(
    dimension_semantics=("parallel",),
    vmem_limit_bytes=32 * 1024 * 1024,
)


# ----------------------------------------------------------------------------
# pallas drivers
# ----------------------------------------------------------------------------
def _follow_loss_pos_pallas(virtual_quat, real_quat, real_postion, *, s_max=1024):
    B = virtual_quat.shape[0]
    rows = pl.cdiv(B, 128)
    s = _choose_rows_per_step(rows, s_max)          # (4, s, 128) f32 <= 2 MiB
    num_tiles = pl.cdiv(rows, s)
    b_pad = num_tiles * s * 128

    def prep(x):
        x = x.astype(jnp.float32)
        pad = b_pad - B
        if pad:
            # identity quaternions: contribute exactly zero error, no mask
            ident = jnp.zeros((pad, 4), jnp.float32).at[:, 3].set(1.0)
            x = jnp.concatenate([x, ident], axis=0)
        # (b_pad, 4) -> (4, b_pad) -> (4, rows_pad, 128): component-major.
        return x.T.reshape(4, b_pad // 128, 128)

    in_spec = pl.BlockSpec((4, s, 128), lambda i: (0, i, 0))
    out_spec = pl.BlockSpec((1, 128), lambda i: (i, 0))

    partials = pl.pallas_call(
        _follow_pos_kernel,
        out_shape=jax.ShapeDtypeStruct((num_tiles, 128), jnp.float32),
        grid=(num_tiles,),
        in_specs=[in_spec, in_spec, in_spec],
        out_specs=out_spec,
        compiler_params=_COMPILER_PARAMS,
    )(prep(virtual_quat), prep(real_quat), prep(real_postion))

    return jnp.sum(partials) / (B * 4)


def _mse_pallas(virtual_quat, real_quat, *, s_max=4096):
    B = virtual_quat.shape[0]
    n = B * 4
    rows = pl.cdiv(n, 128)
    s = _choose_rows_per_step(rows, s_max)          # (s, 128) f32 <= 2 MiB
    num_tiles = pl.cdiv(rows, s)
    n_pad = num_tiles * s * 128

    def prep(x):
        # pure reshape of the row-major (B, 4) buffer: no HBM transpose pass
        x = x.astype(jnp.float32).reshape(-1)
        if n_pad != n:
            x = jnp.pad(x, (0, n_pad - n))          # zeros contribute 0 error
        return x.reshape(n_pad // 128, 128)

    in_spec = pl.BlockSpec((s, 128), lambda i: (i, 0))
    out_spec = pl.BlockSpec((1, 128), lambda i: (i, 0))

    partials = pl.pallas_call(
        _mse_kernel,
        out_shape=jax.ShapeDtypeStruct((num_tiles, 128), jnp.float32),
        grid=(num_tiles,),
        in_specs=[in_spec, in_spec],
        out_specs=out_spec,
        compiler_params=_COMPILER_PARAMS,
    )(prep(virtual_quat), prep(real_quat))

    return jnp.sum(partials) / n


# ----------------------------------------------------------------------------
# pure-JAX reference (same semantics as the kernel; also the tiny-batch path)
# ----------------------------------------------------------------------------
def _reference(virtual_quat, real_quat, real_postion=None):
    virtual_quat = virtual_quat.astype(jnp.float32)
    real_quat = real_quat.astype(jnp.float32)
    if real_postion is not None:
        real_postion = real_postion.astype(jnp.float32)
        x1, y1, z1, w1 = (real_quat[:, i] for i in range(4))
        x2, y2, z2, w2 = (real_postion[:, i] for i in range(4))
        qw = w1 * w2 - x1 * x2 - y1 * y2 - z1 * z2
        qx = w1 * x2 + x1 * w2 + y1 * z2 - z1 * y2
        qy = w1 * y2 + y1 * w2 + z1 * x2 - x1 * z2
        qz = w1 * z2 + z1 * w2 + x1 * y2 - y1 * x2
        q = jnp.stack([qx, qy, qz, qw], axis=1)
        norm = jnp.linalg.norm(q, axis=1, keepdims=True)
        big = norm > 1e-6
        fallback = jnp.concatenate(
            [jnp.zeros_like(q[:, :3]), jnp.ones_like(q[:, 3:4])], axis=1)
        real_quat = jnp.where(big, q / jnp.maximum(norm, 1e-12), fallback)
    d = virtual_quat - real_quat
    return jnp.mean(d * d)


# ----------------------------------------------------------------------------
# public entry point (matches Follow_loss.forward)
# ----------------------------------------------------------------------------
def follow_loss(virtual_quat, real_quat, real_postion=None, *,
                force_pallas=False, min_pallas_batch=512):
    """JAX/Pallas equivalent of Follow_loss.forward.  Returns scalar float32."""
    B, C = virtual_quat.shape
    assert C == 4, "quaternions expected as (B, 4)"
    if not force_pallas and B < min_pallas_batch:
        # pallas_call launch / DMA overhead dwarfs a handful of quaternions of
        # VPU work; let XLA fuse the tiny elementwise graph instead.
        return _reference(virtual_quat, real_quat, real_postion)
    if real_postion is None:
        return _mse_pallas(virtual_quat, real_quat)
    return _follow_loss_pos_pallas(virtual_quat, real_quat, real_postion)


# ----------------------------------------------------------------------------
# self-test
# ----------------------------------------------------------------------------
if __name__ == "__main__":
    key = jax.random.PRNGKey(0)
    keys = jax.random.split(key, 6)

    # --- small case (typical module usage), forced through the kernel -------
    B = 8
    v = jax.random.normal(keys[0], (B, 4), dtype=jnp.float32)
    r = jax.random.normal(keys[1], (B, 4), dtype=jnp.float32)
    p = jax.random.normal(keys[2], (B, 4), dtype=jnp.float32)

    got_pos = jax.block_until_ready(follow_loss(v, r, p, force_pallas=True))
    got_mse = jax.block_until_ready(follow_loss(v, r, force_pallas=True))
    assert jnp.allclose(got_pos, _reference(v, r, p), rtol=1e-5, atol=1e-5)
    assert jnp.allclose(got_mse, _reference(v, r), rtol=1e-5, atol=1e-5)

    # small case via the default (pure-JAX) dispatch path
    assert jnp.allclose(follow_loss(v, r, p), _reference(v, r, p),
                        rtol=1e-5, atol=1e-5)

    # --- multi-tile case: B not a multiple of 128, >= 2 grid steps ----------
    B2 = 4096 + 37
    v2 = jax.random.normal(keys[3], (B2, 4), dtype=jnp.float32)
    r2 = jax.random.normal(keys[4], (B2, 4), dtype=jnp.float32)
    p2 = jax.random.normal(keys[5], (B2, 4), dtype=jnp.float32)

    got2_pos = jax.block_until_ready(follow_loss(v2, r2, p2, force_pallas=True))
    got2_mse = jax.block_until_ready(follow_loss(v2, r2, force_pallas=True))
    assert jnp.allclose(got2_pos, _reference(v2, r2, p2), rtol=1e-5, atol=1e-5)
    assert jnp.allclose(got2_mse, _reference(v2, r2), rtol=1e-5, atol=1e-5)

    print("KERNEL_OK")
</pallas_src>

<mosaic_0001>
module attributes {stable_mosaic.version = 11 : i64} {
  func.func @_follow_pos_kernel(%arg0: i32, %arg1: memref<4x1x128xf32, #tpu.memory_space<vmem>>, %arg2: memref<4x1x128xf32, #tpu.memory_space<vmem>>, %arg3: memref<4x1x128xf32, #tpu.memory_space<vmem>>, %arg4: memref<1x128xf32, #tpu.memory_space<vmem>>) attributes {dimension_semantics = [#tpu.dimension_semantics<parallel>], iteration_bounds = array<i64: 1>, scalar_prefetch = 0 : i64, scratch_operands = 0 : i64, tpu.core_type = #tpu.core_type<tc>, window_params = [{transform_indices = @transform_0, window_bounds = array<i64: 4, 1, 128>}, {transform_indices = @transform_1, window_bounds = array<i64: 4, 1, 128>}, {transform_indices = @transform_2, window_bounds = array<i64: 4, 1, 128>}, {transform_indices = @transform_3, window_bounds = array<i64: 1, 128>}]} {
    %c0 = arith.constant 0 : index
    %c0_0 = arith.constant 0 : index
    %c0_1 = arith.constant 0 : index
    %0 = vector.load %arg1[%c0, %c0_0, %c0_1] : memref<4x1x128xf32, #tpu.memory_space<vmem>>, vector<1x1x128xf32>
    %1 = vector.shape_cast %0 : vector<1x1x128xf32> to vector<1x128xf32>
    %c1 = arith.constant 1 : index
    %c0_2 = arith.constant 0 : index
    %c0_3 = arith.constant 0 : index
    %2 = vector.load %arg1[%c1, %c0_2, %c0_3] : memref<4x1x128xf32, #tpu.memory_space<vmem>>, vector<1x1x128xf32>
    %3 = vector.shape_cast %2 : vector<1x1x128xf32> to vector<1x128xf32>
    %c2 = arith.constant 2 : index
    %c0_4 = arith.constant 0 : index
    %c0_5 = arith.constant 0 : index
    %4 = vector.load %arg1[%c2, %c0_4, %c0_5] : memref<4x1x128xf32, #tpu.memory_space<vmem>>, vector<1x1x128xf32>
    %5 = vector.shape_cast %4 : vector<1x1x128xf32> to vector<1x128xf32>
    %c3 = arith.constant 3 : index
    %c0_6 = arith.constant 0 : index
    %c0_7 = arith.constant 0 : index
    %6 = vector.load %arg1[%c3, %c0_6, %c0_7] : memref<4x1x128xf32, #tpu.memory_space<vmem>>, vector<1x1x128xf32>
    %7 = vector.shape_cast %6 : vector<1x1x128xf32> to vector<1x128xf32>
    %c0_8 = arith.constant 0 : index
    %c0_9 = arith.constant 0 : index
    %c0_10 = arith.constant 0 : index
    %8 = vector.load %arg2[%c0_8, %c0_9, %c0_10] : memref<4x1x128xf32, #tpu.memory_space<vmem>>, vector<1x1x128xf32>
    %9 = vector.shape_cast %8 : vector<1x1x128xf32> to vector<1x128xf32>
    %c1_11 = arith.constant 1 : index
    %c0_12 = arith.constant 0 : index
    %c0_13 = arith.constant 0 : index
    %10 = vector.load %arg2[%c1_11, %c0_12, %c0_13] : memref<4x1x128xf32, #tpu.memory_space<vmem>>, vector<1x1x128xf32>
    %11 = vector.shape_cast %10 : vector<1x1x128xf32> to vector<1x128xf32>
    %c2_14 = arith.constant 2 : index
    %c0_15 = arith.constant 0 : index
    %c0_16 = arith.constant 0 : index
    %12 = vector.load %arg2[%c2_14, %c0_15, %c0_16] : memref<4x1x128xf32, #tpu.memory_space<vmem>>, vector<1x1x128xf32>
    %13 = vector.shape_cast %12 : vector<1x1x128xf32> to vector<1x128xf32>
    %c3_17 = arith.constant 3 : index
    %c0_18 = arith.constant 0 : index
    %c0_19 = arith.constant 0 : index
    %14 = vector.load %arg2[%c3_17, %c0_18, %c0_19] : memref<4x1x128xf32, #tpu.memory_space<vmem>>, vector<1x1x128xf32>
    %15 = vector.shape_cast %14 : vector<1x1x128xf32> to vector<1x128xf32>
    %c0_20 = arith.constant 0 : index
    %c0_21 = arith.constant 0 : index
    %c0_22 = arith.constant 0 : index
    %16 = vector.load %arg3[%c0_20, %c0_21, %c0_22] : memref<4x1x128xf32, #tpu.memory_space<vmem>>, vector<1x1x128xf32>
    %17 = vector.shape_cast %16 : vector<1x1x128xf32> to vector<1x128xf32>
    %c1_23 = arith.constant 1 : index
    %c0_24 = arith.constant 0 : index
    %c0_25 = arith.constant 0 : index
    %18 = vector.load %arg3[%c1_23, %c0_24, %c0_25] : memref<4x1x128xf32, #tpu.memory_space<vmem>>, vector<1x1x128xf32>
    %19 = vector.shape_cast %18 : vector<1x1x128xf32> to vector<1x128xf32>
    %c2_26 = arith.constant 2 : index
    %c0_27 = arith.constant 0 : index
    %c0_28 = arith.constant 0 : index
    %20 = vector.load %arg3[%c2_26, %c0_27, %c0_28] : memref<4x1x128xf32, #tpu.memory_space<vmem>>, vector<1x1x128xf32>
    %21 = vector.shape_cast %20 : vector<1x1x128xf32> to vector<1x128xf32>
    %c3_29 = arith.constant 3 : index
    %c0_30 = arith.constant 0 : index
    %c0_31 = arith.constant 0 : index
    %22 = vector.load %arg3[%c3_29, %c0_30, %c0_31] : memref<4x1x128xf32, #tpu.memory_space<vmem>>, vector<1x1x128xf32>
    %23 = vector.shape_cast %22 : vector<1x1x128xf32> to vector<1x128xf32>
    %24 = arith.mulf %15, %23 : vector<1x128xf32>
    %25 = arith.mulf %9, %17 : vector<1x128xf32>
    %26 = arith.subf %24, %25 : vector<1x128xf32>
    %27 = arith.mulf %11, %19 : vector<1x128xf32>
    %28 = arith.subf %26, %27 : vector<1x128xf32>
    %29 = arith.mulf %13, %21 : vector<1x128xf32>
    %30 = arith.subf %28, %29 : vector<1x128xf32>
    %31 = arith.mulf %15, %17 : vector<1x128xf32>
    %32 = arith.mulf %9, %23 : vector<1x128xf32>
    %33 = arith.addf %31, %32 : vector<1x128xf32>
    %34 = arith.mulf %11, %21 : vector<1x128xf32>
    %35 = arith.addf %33, %34 : vector<1x128xf32>
    %36 = arith.mulf %13, %19 : vector<1x128xf32>
    %37 = arith.subf %35, %36 : vector<1x128xf32>
    %38 = arith.mulf %15, %19 : vector<1x128xf32>
    %39 = arith.mulf %11, %23 : vector<1x128xf32>
    %40 = arith.addf %38, %39 : vector<1x128xf32>
    %41 = arith.mulf %13, %17 : vector<1x128xf32>
    %42 = arith.addf %40, %41 : vector<1x128xf32>
    %43 = arith.mulf %9, %21 : vector<1x128xf32>
    %44 = arith.subf %42, %43 : vector<1x128xf32>
    %45 = arith.mulf %15, %21 : vector<1x128xf32>
    %46 = arith.mulf %13, %23 : vector<1x128xf32>
    %47 = arith.addf %45, %46 : vector<1x128xf32>
    %48 = arith.mulf %9, %19 : vector<1x128xf32>
    %49 = arith.addf %47, %48 : vector<1x128xf32>
    %50 = arith.mulf %11, %17 : vector<1x128xf32>
    %51 = arith.subf %49, %50 : vector<1x128xf32>
    %52 = arith.mulf %37, %37 : vector<1x128xf32>
    %53 = arith.mulf %44, %44 : vector<1x128xf32>
    %54 = arith.addf %52, %53 : vector<1x128xf32>
    %55 = arith.mulf %51, %51 : vector<1x128xf32>
    %56 = arith.addf %54, %55 : vector<1x128xf32>
    %57 = arith.mulf %30, %30 : vector<1x128xf32>
    %58 = arith.addf %56, %57 : vector<1x128xf32>
    %cst = arith.constant 9.99999996E-13 : f32
    %59 = vector.broadcast %cst : f32 to vector<1x128xf32>
    %60 = arith.maximumf %58, %59 : vector<1x128xf32>
    %61 = math.rsqrt %60 : vector<1x128xf32>
    %cst_32 = arith.constant 9.99999996E-13 : f32
    %62 = vector.broadcast %cst_32 : f32 to vector<1x128xf32>
    %63 = arith.cmpf ogt, %58, %62 : vector<1x128xf32>
    %64 = arith.mulf %37, %61 : vector<1x128xf32>
    %cst_33 = arith.constant 0.000000e+00 : f32
    %65 = vector.broadcast %cst_33 : f32 to vector<1x128xf32>
    %66 = arith.select %63, %64, %65 : vector<1x128xi1>, vector<1x128xf32>
    %67 = arith.subf %1, %66 : vector<1x128xf32>
    %68 = arith.mulf %44, %61 : vector<1x128xf32>
    %cst_34 = arith.constant 0.000000e+00 : f32
    %69 = vector.broadcast %cst_34 : f32 to vector<1x128xf32>
    %70 = arith.select %63, %68, %69 : vector<1x128xi1>, vector<1x128xf32>
    %71 = arith.subf %3, %70 : vector<1x128xf32>
    %72 = arith.mulf %51, %61 : vector<1x128xf32>
    %cst_35 = arith.constant 0.000000e+00 : f32
    %73 = vector.broadcast %cst_35 : f32 to vector<1x128xf32>
    %74 = arith.select %63, %72, %73 : vector<1x128xi1>, vector<1x128xf32>
    %75 = arith.subf %5, %74 : vector<1x128xf32>
    %76 = arith.mulf %30, %61 : vector<1x128xf32>
    %cst_36 = arith.constant 1.000000e+00 : f32
    %77 = vector.broadcast %cst_36 : f32 to vector<1x128xf32>
    %78 = arith.select %63, %76, %77 : vector<1x128xi1>, vector<1x128xf32>
    %79 = arith.subf %7, %78 : vector<1x128xf32>
    %80 = arith.mulf %67, %67 : vector<1x128xf32>
    %81 = arith.mulf %71, %71 : vector<1x128xf32>
    %82 = arith.addf %80, %81 : vector<1x128xf32>
    %83 = arith.mulf %75, %75 : vector<1x128xf32>
    %84 = arith.addf %82, %83 : vector<1x128xf32>
    %85 = arith.mulf %79, %79 : vector<1x128xf32>
    %86 = arith.addf %84, %85 : vector<1x128xf32>
    %cst_37 = arith.constant dense<0.000000e+00> : vector<128xf32>
    %87 = vector.multi_reduction <add>, %86, %cst_37 [0] : vector<1x128xf32> to vector<128xf32>
    %88 = vector.shape_cast %87 : vector<128xf32> to vector<1x128xf32>
    %c0_38 = arith.constant 0 : index
    %c0_39 = arith.constant 0 : index
    %89 = vector.load %arg4[%c0_38, %c0_39] : memref<1x128xf32, #tpu.memory_space<vmem>>, vector<1x128xf32>
    tpu.vector_store %arg4[%c0_38, %c0_39], %88 {strides = array<i32>} : memref<1x128xf32, #tpu.memory_space<vmem>>, vector<1x128xf32>,
    return
  }
  func.func @transform_0(%arg0: i32) -> (i32, i32, i32) {
    %c0_i32 = arith.constant 0 : i32
    %c0_i32_0 = arith.constant 0 : i32
    %c0_i32_1 = arith.constant 0 : i32
    return %c0_i32, %arg0, %c0_i32_0 : i32, i32, i32
  }
  func.func @transform_1(%arg0: i32) -> (i32, i32, i32) {
    %c0_i32 = arith.constant 0 : i32
    %c0_i32_0 = arith.constant 0 : i32
    %c0_i32_1 = arith.constant 0 : i32
    return %c0_i32, %arg0, %c0_i32_0 : i32, i32, i32
  }
  func.func @transform_2(%arg0: i32) -> (i32, i32, i32) {
    %c0_i32 = arith.constant 0 : i32
    %c0_i32_0 = arith.constant 0 : i32
    %c0_i32_1 = arith.constant 0 : i32
    return %c0_i32, %arg0, %c0_i32_0 : i32, i32, i32
  }
  func.func @transform_3(%arg0: i32) -> (i32, i32) {
    %c0_i32 = arith.constant 0 : i32
    %c0_i32_0 = arith.constant 0 : i32
    return %arg0, %c0_i32 : i32, i32
  }
}

</mosaic_0001>

<bundles_post_ra>
// kernel: tpu_custom_call.1
= control target key start
LH: loop header
LB: loop body
LE: loop exit
PB: predicated region body
PF: predicated region fallthrough
CT: control target
= control target key end

     0   :  { %8 = vsyncpa [#allocation3], 0  ;;  %s294_s0 = inlined_call_operand.hbm [shape: f32[4,1,128], index: 0, kind: input, shape index: {}]   ;;  %s295_s1 = inlined_call_operand.hbm [shape: f32[4,1,128], index: 1, kind: input, shape index: {}]   ;;  %s296_s2 = inlined_call_operand.vmem [shape: f32[4,1,128], index: 2, kind: input, shape index: {}]   ;;  %s297_s3 = inlined_call_operand.hbm [shape: f32[1,128], index: 3, kind: output, shape index: {}]  }
   0x1   :  { %9 = vsyncpa [#allocation6], 0 }
   0x2   :  { %10 = vsyncpa [#allocation4], 0  ;;  %s221_s12 = smov [#allocation2]   ;;  %s149_s16 = scalar_lea.hbm %s294_s0, 64 }
   0x3   :  { %s16_s13 = sshll.u32 %s221_s12, 4  ;;  %p150_p0 = scmp.ne.s32.totalorder %s294_s0, %s149_s16  ;;  %s17_s13 = int_to_ptr.vmem [resolvable:$true] %s16_s13 }
   0x4   :  { %p153_p1 = scmp.lt.u32.totalorder %s149_s16, %s294_s0 }
   0x6   :  { %p155_p2 = pnand %p153_p1, %p150_p0 }
   0x8   :  { %158 = shalt.err (!%p155_p2)
}
   0x9   :  { %s159_s21 = scalar_lea.vmem %s17_s13, 64  ;;  %p164_p4 = scmp.lt.s32.totalorder %s17_s13, %s17_s13 }
   0xa   :  { %p160_p3 = scmp.ne.s32.totalorder %s17_s13, %s159_s21  ;;  %p165_p5 = scmp.lt.s32.totalorder %s159_s21, %s159_s21 }
   0xc   :  { %p166_p6 = por %p165_p5, %p164_p4 }
   0xe   :  { %p167_p7 = pnand %p166_p6, %p160_p3 }
  0x10   :  { %170 = shalt.err (!%p167_p7)
}
  0x11   :  { %s222_s22 = smov 16   ;;  %s223_s23 = smov 1  }
  0x12   :  { %22 = dma.hbm_to_vmem [thread:$0]  %s294_s0, 64, %s17_s13, [#allocation3], %s222_s22, %s222_s22, %s223_s23  }
  0x13   :  { %s224_s26 = smov [#allocation5]   ;;  %s171_s30 = scalar_lea.hbm %s295_s1, 64 }
  0x14   :  { %s28_s27 = sshll.u32 %s224_s26, 4  ;;  %p172_p8 = scmp.ne.s32.totalorder %s295_s1, %s171_s30  ;;  %s29_s27 = int_to_ptr.vmem [resolvable:$true] %s28_s27 }
  0x15   :  { %p175_p9 = scmp.lt.u32.totalorder %s171_s30, %s295_s1 }
  0x17   :  { %p177_p10 = pnand %p175_p9, %p172_p8 }
  0x19   :  { %180 = shalt.err (!%p177_p10)
}
  0x1a   :  { %s181_s8 = scalar_lea.vmem %s29_s27, 64  ;;  %p186_p12 = scmp.lt.s32.totalorder %s29_s27, %s29_s27 }
  0x1b   :  { %p182_p11 = scmp.ne.s32.totalorder %s29_s27, %s181_s8  ;;  %p187_p13 = scmp.lt.s32.totalorder %s181_s8, %s181_s8 }
  0x1d   :  { %p188_p0 = por %p187_p13, %p186_p12 }
  0x1f   :  { %p189_p1 = pnand %p188_p0, %p182_p11 }
  0x21   :  { %192 = shalt.err (!%p189_p1)
}
  0x22   :  { %34 = dma.hbm_to_vmem [thread:$0]  %s295_s1, 64, %s29_s27, [#allocation6], %s222_s22, %s222_s22, %s223_s23  }
  0x23   :  { %215 = dma.done.wait [#allocation3], 64  }
  0x24   :  { %216 = vsyncadd [#allocation3], 4294967232 }
  0x25   :  { %217 = dma.done.wait [#allocation6], 64  }
  0x26   :  { %218 = vsyncadd [#allocation6], 4294967232  ;;  %v50_v0 = vld [vmem:[#allocation5] sm:$0x1]  ;;  %v52_v1 = vld [vmem:[#allocation5 + $0x1] sm:$0x1] }
  0x27   :  { %v54_v2 = vld [vmem:[#allocation5 + $0x2] sm:$0x1]  ;;  %v56_v3 = vld [vmem:[#allocation5 + $0x3] sm:$0x1]  ;;  %v57_v4 = vld [vmem:[%s296_s2] sm:$0x1] }
  0x28   :  { %v139_v5 = vld [vmem:[%s296_s2 + $0x1] sm:$0x1]  ;;  %v140_v6 = vld [vmem:[%s296_s2 + $0x2] sm:$0x1]  ;;  %v141_v7 = vld [vmem:[%s296_s2 + $0x3] sm:$0x1]  ;;  %v65_v8 = vmul.f32 %v57_v4, %v50_v0  ;;  %v71_v9 = vmul.f32 %v57_v4, %v56_v3  ;;  %v81_v13 = vmul.f32 %v57_v4, %v54_v2  ;;  %v90_v30 = vmul.f32 %v57_v4, %v52_v1 }
  0x29   :  { %v64_v10 = vmul.f32 %v141_v7, %v56_v3  ;;  %v67_v11 = vmul.f32 %v139_v5, %v52_v1  ;;  %v72_v12 = vmul.f32 %v141_v7, %v50_v0  ;;  %v69_v14 = vmul.f32 %v140_v6, %v54_v2  ;;  %v43_v45 = vld [vmem:[#allocation2] sm:$0x1]  ;;  %v45_v46 = vld [vmem:[#allocation2 + $0x1] sm:$0x1]  ;;  %v47_v47 = vld [vmem:[#allocation2 + $0x2] sm:$0x1] }
  0x2a   :  { %v74_v15 = vmul.f32 %v140_v6, %v52_v1  ;;  %v78_v16 = vmul.f32 %v139_v5, %v56_v3  ;;  %v79_v17 = vmul.f32 %v141_v7, %v52_v1  ;;  %v76_v20 = vmul.f32 %v139_v5, %v54_v2  ;;  %v49_v48 = vld [vmem:[#allocation2 + $0x3] sm:$0x1]  ;;  %s225_s2 = smov [#allocation7]  }
  0x2b   :  { %v66_v18 = vsub.f32 %v64_v10, %v65_v8  ;;  %v73_v19 = vadd.f32 %v72_v12, %v71_v9  ;;  %v85_v21 = vmul.f32 %v140_v6, %v56_v3  ;;  %v83_v23 = vmul.f32 %v140_v6, %v50_v0  ;;  %s129_s17 = sshll.u32 %s225_s2, 4  ;;  %s130_s17 = int_to_ptr.vmem [resolvable:$true] %s129_s17 }
  0x2c   :  { %v80_v22 = vadd.f32 %v79_v17, %v78_v16  ;;  %v86_v24 = vmul.f32 %v141_v7, %v54_v2  ;;  %v88_v25 = vmul.f32 %v139_v5, %v50_v0  ;;  %s193_s18 = scalar_lea.vmem %s130_s17, 16  ;;  %s197_s19 = scalar_lea.vmem %s130_s17, 32 }
  0x2d   :  { %v68_v26 = vsub.f32 %v66_v18, %v67_v11  ;;  %v75_v27 = vadd.f32 %v74_v15, %v73_v19  ;;  %p194_p2 = scmp.ne.s32.totalorder %s130_s17, %s193_s18  ;;  %p198_p3 = scmp.lt.s32.totalorder %s130_s17, %s130_s17 }
  0x2e   :  { %v82_v28 = vadd.f32 %v81_v13, %v80_v22  ;;  %v87_v29 = vadd.f32 %v86_v24, %v85_v21  ;;  %p199_p4 = scmp.lt.s32.totalorder %s197_s19, %s193_s18 }
  0x2f   :  { %v77_v31 = vsub.f32 %v75_v27, %v76_v20  ;;  %v70_v32 = vsub.f32 %v68_v26, %v69_v14 }
  0x30   :  { %v84_v33 = vsub.f32 %v82_v28, %v83_v23  ;;  %v89_v34 = vadd.f32 %v88_v25, %v87_v29  ;;  %p200_p5 = por %p199_p4, %p198_p3 }
  0x31   :  { %v92_v35 = vmul.f32 %v77_v31, %v77_v31  ;;  %v97_v40 = vmul.f32 %v70_v32, %v70_v32 }
  0x32   :  { %v91_v36 = vsub.f32 %v89_v34, %v90_v30  ;;  %v93_v37 = vmul.f32 %v84_v33, %v84_v33  ;;  %p201_p6 = pnand %p200_p5, %p194_p2 }
  0x34   :  { %v94_v38 = vadd.f32 %v93_v37, %v92_v35  ;;  %v95_v39 = vmul.f32 %v91_v36, %v91_v36 }
  0x36   :  { %v96_v41 = vadd.f32 %v95_v39, %v94_v38 }
  0x38   :  { %v98_v42 = vadd.f32 %v97_v40, %v96_v41 }
  0x3a   :  { %v99_v43 = vmax.f32 %v98_v42, 1e-12  ;;  %vm101_vm0 = vcmp.gt.f32.partialorder %v98_v42, 1e-12 }
  0x3c   :  { %147 = vrsqrt.f32 %v99_v43 }
  0x46   :  { %v148_v44 = vpop.eup %147 }
  0x47   :  { %v102_v49 = vmul.f32 %v148_v44, %v77_v31  ;;  %v105_v50 = vmul.f32 %v148_v44, %v84_v33  ;;  %v108_v51 = vmul.f32 %v148_v44, %v91_v36  ;;  %v111_v52 = vmul.f32 %v148_v44, %v70_v32 }
  0x49   :  { %v103_v53 = vsel %vm101_vm0, %v102_v49, 0.0  ;;  %v106_v54 = vsel %vm101_vm0, %v105_v50, 0.0  ;;  %v109_v55 = vsel %vm101_vm0, %v108_v51, 0.0  ;;  %v112_v56 = vsel %vm101_vm0, %v111_v52, 1.0 }
  0x4a   :  { %v104_v57 = vsub.f32 %v43_v45, %v103_v53  ;;  %v107_v58 = vsub.f32 %v45_v46, %v106_v54  ;;  %v110_v59 = vsub.f32 %v47_v47, %v109_v55  ;;  %v113_v60 = vsub.f32 %v49_v48, %v112_v56 }
  0x4c   :  { %v114_v61 = vmul.f32 %v104_v57, %v104_v57  ;;  %v115_v62 = vmul.f32 %v107_v58, %v107_v58  ;;  %v117_v63 = vmul.f32 %v110_v59, %v110_v59  ;;  %v119_v1 = vmul.f32 %v113_v60, %v113_v60 }
  0x4e   :  { %v116_v0 = vadd.f32 %v115_v62, %v114_v61 }
  0x50   :  { %v118_v2 = vadd.f32 %v117_v63, %v116_v0 }
  0x52   :  { %v120_v3 = vadd.f32 %v119_v1, %v118_v2 }
  0x54   :  { %122 = vst [vmem:[#allocation7] sm:$0x1] %v120_v3 }
  0x55   :  { %204 = shalt.err (!%p201_p6)
}
  0x56   :  { %s205_s22 = scalar_lea.hbm %s297_s3, 16 }
  0x57   :  { %p206_p7 = scmp.ne.s32.totalorder %s297_s3, %s205_s22  ;;  %p209_p8 = scmp.lt.u32.totalorder %s205_s22, %s297_s3 }
  0x59   :  { %p211_p9 = pnand %p209_p8, %p206_p7 }
  0x5b   :  { %214 = shalt.err (!%p211_p9)
}
  0x5c   :  { %132 = dma.vmem_to_hbm [thread:$0]  %s130_s17, 16, %s297_s3, [#allocation4]  }
  0x5d   :  { %219 = dma.done.wait [#allocation4], 16  }
  0x5e   :  { %220 = vsyncadd [#allocation4], 4294967280 }
  0x5f   :  { %136 = vsyncpa [#allocation3], 1 }
  0x60   :  { %137 = vsyncpa [#allocation6], 1 }
  0x61   :  { %138 = vsyncpa [#allocation4], 1 }

</bundles_post_ra>
